<compile_context>
chip_gen: v6e
topology: v6e:2x2x1
jax: 0.10.0
libtpu: 0.0.40
codegen_flags: <defaults>
</compile_context>

<pallas_src>
import jax
import jax.numpy as jnp
from jax.experimental import pallas as pl
from jax.experimental.pallas import tpu as pltpu

_LANES = 512        # lane-dense last dim (multiple of 128)
_BLOCK_ROWS = 1024  # rows per grid step: 1024*512*4B = 2 MiB f32 per block


def _copy_kernel(x_ref, o_ref):
    # Identity elementwise copy (the only "compute" unsqueeze could need).
    o_ref[...] = x_ref[...]


def _pallas_identity_copy(x: jax.Array) -> jax.Array:
    """Stream `x` through a tiled, lane-dense Pallas copy, preserving shape/dtype."""
    orig_shape = x.shape
    n = int(x.size)
    if n == 0:
        # Empty tensors: nothing to copy; reshape is pure metadata.
        return x

    flat = x.reshape(-1)
    pad = (-n) % _LANES
    if pad:
        flat = jnp.pad(flat, (0, pad))
    rows = flat.size // _LANES
    x2d = flat.reshape(rows, _LANES)

    # If the whole slab is small, use it as a single full-extent block
    # (full-dim blocks are exempt from the (8, 128) divisibility rule).
    block_rows = rows if rows < _BLOCK_ROWS else _BLOCK_ROWS
    grid = (pl.cdiv(rows, block_rows),)

    out2d = pl.pallas_call(
        _copy_kernel,
        out_shape=jax.ShapeDtypeStruct((rows, _LANES), x2d.dtype),
        grid=grid,
        in_specs=[pl.BlockSpec((block_rows, _LANES), lambda i: (i, 0))],
        out_specs=pl.BlockSpec((block_rows, _LANES), lambda i: (i, 0)),
        compiler_params=pltpu.CompilerParams(
            dimension_semantics=("parallel",)),
    )(x2d)

    return out2d.reshape(-1)[:n].reshape(orig_shape)


class Unsqueeze:
    """JAX equivalent of the PyTorch Unsqueeze module.

    forward(x) -> x with a size-1 axis inserted at `dim` (torch semantics,
    negative dims allowed).  Default path is zero-copy metadata; pass
    materialize=True to force a fresh buffer via the Pallas copy kernel.
    """

    def __init__(self, dim: int, materialize: bool = False) -> None:
        self.dim = dim
        self.materialize = materialize

    def __call__(self, x: jax.Array) -> jax.Array:
        ndim = x.ndim
        dim = self.dim
        if dim < 0:
            dim = dim + ndim + 1
        assert 0 <= dim <= ndim, f"invalid unsqueeze dim {self.dim} for ndim {ndim}"

        new_shape = x.shape[:dim] + (1,) + x.shape[dim:]
        if self.materialize:
            # Optional: materialize a copy through the tiled Pallas kernel.
            return _pallas_identity_copy(x).reshape(new_shape)
        # Hot path: pure metadata, zero HBM traffic (matches torch view semantics).
        return jnp.expand_dims(x, dim)


if __name__ == "__main__":
    key = jax.random.PRNGKey(0)
    # layout: NCHW input, small shapes
    x = jax.random.normal(key, (2, 4, 16, 16), dtype=jnp.float32)

    # 1) Default zero-copy path.
    out = jax.block_until_ready(Unsqueeze(dim=1)(x))
    ref = jnp.expand_dims(x, 1)
    assert out.shape == (2, 1, 4, 16, 16), out.shape
    assert out.dtype == x.dtype
    assert bool(jnp.array_equal(out, ref))

    # 2) Materialized path exercising the tiled Pallas copy kernel.
    out_mat = jax.block_until_ready(Unsqueeze(dim=1, materialize=True)(x))
    assert out_mat.shape == (2, 1, 4, 16, 16)
    assert bool(jnp.array_equal(out_mat, ref))

    # 3) Negative dim (torch allows dim in [-(ndim+1), ndim]).
    out_neg = jax.block_until_ready(Unsqueeze(dim=-1)(x))
    assert out_neg.shape == (2, 4, 16, 16, 1)
    assert bool(jnp.array_equal(out_neg, jnp.expand_dims(x, -1)))

    # 4) Pallas copy path with a size not divisible by the lane width,
    #    and a non-f32 dtype.
    y = jax.random.normal(key, (3, 5, 7), dtype=jnp.bfloat16)
    out_y = jax.block_until_ready(Unsqueeze(dim=0, materialize=True)(y))
    assert out_y.shape == (1, 3, 5, 7)
    assert out_y.dtype == y.dtype
    assert bool(jnp.array_equal(out_y, jnp.expand_dims(y, 0)))

    # 5) Empty tensor (valid in torch.unsqueeze).
    z = jnp.zeros((0, 16), dtype=jnp.float32)
    out_z = jax.block_until_ready(Unsqueeze(dim=1, materialize=True)(z))
    assert out_z.shape == (0, 1, 16)

    print("KERNEL_OK")
</pallas_src>

<mosaic_0001>
module attributes {stable_mosaic.version = 11 : i64} {
  func.func @_copy_kernel(%arg0: i32, %arg1: memref<4x512xf32, #tpu.memory_space<vmem>>, %arg2: memref<4x512xf32, #tpu.memory_space<vmem>>) attributes {dimension_semantics = [#tpu.dimension_semantics<parallel>], iteration_bounds = array<i64: 1>, scalar_prefetch = 0 : i64, scratch_operands = 0 : i64, tpu.core_type = #tpu.core_type<tc>, window_params = [{transform_indices = @transform_0, window_bounds = array<i64: 4, 512>}, {transform_indices = @transform_1, window_bounds = array<i64: 4, 512>}]} {
    %c0 = arith.constant 0 : index
    %c0_0 = arith.constant 0 : index
    %0 = vector.load %arg1[%c0, %c0_0] : memref<4x512xf32, #tpu.memory_space<vmem>>, vector<4x512xf32>
    %c0_1 = arith.constant 0 : index
    %c0_2 = arith.constant 0 : index
    %1 = vector.load %arg2[%c0_1, %c0_2] : memref<4x512xf32, #tpu.memory_space<vmem>>, vector<4x512xf32>
    tpu.vector_store %arg2[%c0_1, %c0_2], %0 {strides = array<i32>} : memref<4x512xf32, #tpu.memory_space<vmem>>, vector<4x512xf32>,
    return
  }
  func.func @transform_0(%arg0: i32) -> (i32, i32) {
    %c0_i32 = arith.constant 0 : i32
    %c0_i32_0 = arith.constant 0 : i32
    return %arg0, %c0_i32 : i32, i32
  }
  func.func @transform_1(%arg0: i32) -> (i32, i32) {
    %c0_i32 = arith.constant 0 : i32
    %c0_i32_0 = arith.constant 0 : i32
    return %arg0, %c0_i32 : i32, i32
  }
}

</mosaic_0001>

<bundles_post_ra>
// kernel: tpu_custom_call.1
= control target key start
LH: loop header
LB: loop body
LE: loop exit
PB: predicated region body
PF: predicated region fallthrough
CT: control target
= control target key end

     0   :  { %6 = vsyncpa [#allocation3], 0  ;;  %s104_s0 = inlined_call_operand.hbm [shape: f32[4,512], index: 0, kind: input, shape index: {}]   ;;  %s105_s1 = inlined_call_operand.hbm [shape: f32[4,512], index: 1, kind: output, shape index: {}]  }
   0x1   :  { %7 = vsyncpa [#allocation4], 0  ;;  %s86_s6 = smov [#allocation2]  }
   0x2   :  { %s14_s7 = sshll.u32 %s86_s6, 4  ;;  %s15_s7 = int_to_ptr.vmem [resolvable:$true] %s14_s7 }
   0x3   :  { %s50_s8 = scalar_lea.vmem %s15_s7, 256  ;;  %p55_p1 = scmp.lt.s32.totalorder %s15_s7, %s15_s7 }
   0x4   :  { %p51_p0 = scmp.ne.s32.totalorder %s15_s7, %s50_s8  ;;  %p56_p2 = scmp.lt.s32.totalorder %s50_s8, %s50_s8 }
   0x6   :  { %p57_p3 = por %p56_p2, %p55_p1 }
   0x8   :  { %p58_p4 = pnand %p57_p3, %p51_p0 }
   0xa   :  { %61 = shalt.err (!%p58_p4)
}
   0xb   :  { %17 = dma.hbm_to_vmem [thread:$0]  %s104_s0, 256, %s15_s7, [#allocation3]  }
   0xc   :  { %82 = dma.done.wait [#allocation3], 256  }
   0xd   :  { %83 = vsyncadd [#allocation3], 4294967040  ;;  %s87_s11 = smov [#allocation5]   ;;  %v21_v0 = vld [vmem:[#allocation2] sm:$0xff]  ;;  %v22_v1 = vld [vmem:[#allocation2 + $0x8] sm:$0xff] }
   0xe   :  { %s31_s12 = sshll.u32 %s87_s11, 4  ;;  %23 = vst [vmem:[#allocation5] sm:$0xff] %v21_v0  ;;  %24 = vst [vmem:[#allocation5 + $0x8] sm:$0xff] %v22_v1  ;;  %s32_s12 = int_to_ptr.vmem [resolvable:$true] %s31_s12 }
   0xf   :  { %s62_s13 = scalar_lea.vmem %s32_s12, 256  ;;  %p67_p6 = scmp.lt.s32.totalorder %s32_s12, %s32_s12 }
  0x10   :  { %p63_p5 = scmp.ne.s32.totalorder %s32_s12, %s62_s13  ;;  %p68_p7 = scmp.lt.s32.totalorder %s62_s13, %s62_s13 }
  0x12   :  { %p69_p8 = por %p68_p7, %p67_p6 }
  0x14   :  { %p70_p9 = pnand %p69_p8, %p63_p5 }
  0x16   :  { %73 = shalt.err (!%p70_p9)
}
  0x17   :  { %34 = dma.vmem_to_hbm [thread:$0]  %s32_s12, 256, %s105_s1, [#allocation4]  }
  0x18   :  { %84 = dma.done.wait [#allocation4], 256  }
  0x19   :  { %85 = vsyncadd [#allocation4], 4294967040 }
  0x1a   :  { %38 = vsyncpa [#allocation3], 1 }
  0x1b   :  { %39 = vsyncpa [#allocation4], 1 }

</bundles_post_ra>
